<compile_context>
chip_gen: v5e
topology: v5e:2x2
jax: 0.10.0
libtpu: 0.0.40
codegen_flags: <defaults>
</compile_context>

<pallas_src>
import numpy as np
import jax
import jax.numpy as jnp
from jax.experimental import pallas as pl
from jax.experimental.pallas import tpu as pltpu


def _fused_forward_kernel(img_ref, msk_ref, lab_ref, out_ref):
    # img_ref : VMEM (1, C,   T)   images, flattened spatial tile
    # msk_ref : VMEM (1, Cm,  T)   masks (Cm == C or Cm == 1; any int/float dtype)
    # lab_ref : VMEM (1, 1,   T)   this batch element's embedding row, tiled along T
    # out_ref : VMEM (1, C+1, T)   bf16 backbone input
    c = out_ref.shape[1] - 1
    m = msk_ref[...].astype(jnp.float32)
    merged = img_ref[...].astype(jnp.float32) * (1.0 - m) + m          # broadcasts Cm=1
    out_ref[:, 0:c, :] = merged.astype(out_ref.dtype)
    out_ref[:, c:c + 1, :] = lab_ref[...].astype(out_ref.dtype)


def _choose_tile(hw, bytes_per_pos, batch, budget_bytes=12 * 1024 * 1024):
    """Largest tile on the flattened H*W axis that is a multiple of 128, divides HW,
    and keeps the double-buffered working set under `budget_bytes`. Guarantees >= 2
    total grid steps when batch == 1 (v7x has two TensorCores)."""
    cands = [d for d in range(128, hw + 1, 128) if hw % d == 0]
    if not cands:
        cands = [hw]                                   # tiny inputs: one full-extent block
    if batch == 1:
        split = [d for d in cands if hw // d >= 2]
        if split:
            cands = split
    fitting = [d for d in cands if d * bytes_per_pos <= budget_bytes]
    return max(fitting) if fitting else min(cands)


def landmark_detector_forward(params, images, masks, label, out_dtype=jnp.bfloat16):
    """Fused Pallas forward prefix: returns the [B, C+1, H, W] MobileNetV2 input.

    TODO(synk): MobileNetV2 (self.mbnet) and the `landmark_gen *= config.INPUT_SIZE`
    scaling are not defined in the reference source, so landmark_gen / pre_label are
    not computed here.
    """
    B, C, H, W = images.shape
    Cm = masks.shape[1]
    emb = params["embedding"].astype(jnp.float32)                      # (2, E), E == 16
    E = emb.shape[1]
    assert W % E == 0, "W must be a multiple of the embedding dim (16)"
    HW = H * W

    # Flatten spatial dims so the lane axis is large and 128-aligned (lane-dense stores).
    img_flat = images.reshape(B, C, HW)
    msk_flat = masks.reshape(B, Cm, HW)

    img_b = images.dtype.itemsize
    msk_b = masks.dtype.itemsize
    out_b = jnp.dtype(out_dtype).itemsize
    bytes_per_pos = 2 * (C * img_b + Cm * msk_b + (C + 1) * out_b + 4)  # double-buffered
    T = _choose_tile(HW, bytes_per_pos, B)
    nt = HW // T

    # Label channel has period E along the flattened axis and T % E == 0, so one
    # (1, 1, T) row per batch element serves every spatial tile. Gather is done in
    # plain JAX (tiny: B x T floats) -> no data-dependent DMA, labels are clamped.
    lab_rows = jnp.tile(emb[label.astype(jnp.int32)], (1, T // E)).reshape(B, 1, T)

    grid_spec = pltpu.PrefetchScalarGridSpec(
        num_scalar_prefetch=0,
        grid=(B, nt),
        in_specs=[
            pl.BlockSpec((1, C, T), lambda b, t: (b, 0, t)),
            pl.BlockSpec((1, Cm, T), lambda b, t: (b, 0, t)),
            pl.BlockSpec((1, 1, T), lambda b, t: (b, 0, 0)),   # reused across tiles
        ],
        out_specs=pl.BlockSpec((1, C + 1, T), lambda b, t: (b, 0, t)),
    )

    out_flat = pl.pallas_call(
        _fused_forward_kernel,
        out_shape=jax.ShapeDtypeStruct((B, C + 1, HW), out_dtype),
        grid_spec=grid_spec,
        compiler_params=pltpu.CompilerParams(
            dimension_semantics=("parallel", "parallel"),
            vmem_limit_bytes=32 * 1024 * 1024,
        ),
    )(img_flat, msk_flat, lab_rows)

    return out_flat.reshape(B, C + 1, H, W)


if __name__ == "__main__":
    key = jax.random.PRNGKey(0)
    k = jax.random.split(key, 3)
    B, C, H, W = 2, 3, 32, 32

    images = jax.random.uniform(k[0], (B, C, H, W), jnp.float32)
    # single-channel binary mask stored as uint8 (broadcast over channels, cheap to read)
    masks = (jax.random.uniform(k[1], (B, 1, H, W)) > 0.5).astype(jnp.uint8)
    label = jnp.array([0, 1], dtype=jnp.int32)
    # nn.Embedding(2, 16) default init ~ N(0, 1); modeled as a deterministic param.
    params = {"embedding": jax.random.normal(k[2], (2, 16), jnp.float32)}

    out = landmark_detector_forward(params, images, masks, label)
    out = jax.block_until_ready(out)

    # Pure-JAX reference of the same forward prefix.
    m = masks.astype(jnp.float32)
    ref_masked = images * (1.0 - m) + m
    lab_rows = jnp.tile(params["embedding"], (1, W // 16))[label]        # (B, W)
    ref_label = jnp.broadcast_to(lab_rows[:, None, None, :], (B, 1, H, W))
    ref = jnp.concatenate([ref_masked, ref_label], axis=1)

    assert out.shape == (B, C + 1, H, W)
    assert out.dtype == jnp.bfloat16
    np.testing.assert_allclose(
        np.asarray(out, dtype=np.float32), np.asarray(ref), rtol=2e-2, atol=2e-2
    )
    print("KERNEL_OK")
</pallas_src>

<mosaic_0001>
module attributes {stable_mosaic.version = 11 : i64} {
  func.func @_fused_forward_kernel(%arg0: i32, %arg1: i32, %arg2: memref<1x3x1024xf32, #tpu.memory_space<vmem>>, %arg3: memref<1x1x1024xi8, #tpu.memory_space<vmem>>, %arg4: memref<1x1x1024xf32, #tpu.memory_space<vmem>>, %arg5: memref<1x4x1024xbf16, #tpu.memory_space<vmem>>) attributes {dimension_semantics = [#tpu.dimension_semantics<parallel>, #tpu.dimension_semantics<parallel>], iteration_bounds = array<i64: 2, 1>, scalar_prefetch = 0 : i64, scratch_operands = 0 : i64, tpu.core_type = #tpu.core_type<tc>, window_params = [{transform_indices = @transform_0, window_bounds = array<i64: 1, 3, 1024>}, {transform_indices = @transform_1, window_bounds = array<i64: 1, 1, 1024>}, {transform_indices = @transform_2, window_bounds = array<i64: 1, 1, 1024>}, {transform_indices = @transform_3, window_bounds = array<i64: 1, 4, 1024>}]} {
    %c0 = arith.constant 0 : index
    %c0_0 = arith.constant 0 : index
    %c0_1 = arith.constant 0 : index
    %0 = vector.load %arg3[%c0, %c0_0, %c0_1] : memref<1x1x1024xi8, #tpu.memory_space<vmem>>, vector<1x1x1024xi8>
    %1 = arith.uitofp %0 : vector<1x1x1024xi8> to vector<1x1x1024xf32>
    %c0_2 = arith.constant 0 : index
    %c0_3 = arith.constant 0 : index
    %c0_4 = arith.constant 0 : index
    %2 = vector.load %arg2[%c0_2, %c0_3, %c0_4] : memref<1x3x1024xf32, #tpu.memory_space<vmem>>, vector<1x3x1024xf32>
    %cst = arith.constant 1.000000e+00 : f32
    %3 = vector.broadcast %cst : f32 to vector<1x1x1024xf32>
    %4 = arith.subf %3, %1 : vector<1x1x1024xf32>
    %5 = vector.broadcast %4 : vector<1x1x1024xf32> to vector<1x3x1024xf32>
    %6 = arith.mulf %2, %5 : vector<1x3x1024xf32>
    %7 = vector.broadcast %1 : vector<1x1x1024xf32> to vector<1x3x1024xf32>
    %8 = arith.addf %6, %7 : vector<1x3x1024xf32>
    %9 = arith.truncf %8 : vector<1x3x1024xf32> to vector<1x3x1024xbf16>
    %c0_5 = arith.constant 0 : index
    %c0_6 = arith.constant 0 : index
    %c0_7 = arith.constant 0 : index
    %10 = vector.load %arg5[%c0_5, %c0_6, %c0_7] : memref<1x4x1024xbf16, #tpu.memory_space<vmem>>, vector<1x3x1024xbf16>
    tpu.vector_store %arg5[%c0_5, %c0_6, %c0_7], %9 {strides = array<i32>} : memref<1x4x1024xbf16, #tpu.memory_space<vmem>>, vector<1x3x1024xbf16>,
    %c0_8 = arith.constant 0 : index
    %c0_9 = arith.constant 0 : index
    %c0_10 = arith.constant 0 : index
    %11 = vector.load %arg4[%c0_8, %c0_9, %c0_10] : memref<1x1x1024xf32, #tpu.memory_space<vmem>>, vector<1x1x1024xf32>
    %12 = arith.truncf %11 : vector<1x1x1024xf32> to vector<1x1x1024xbf16>
    %c0_11 = arith.constant 0 : index
    %c3 = arith.constant 3 : index
    %c0_12 = arith.constant 0 : index
    %13 = vector.load %arg5[%c0_11, %c3, %c0_12] : memref<1x4x1024xbf16, #tpu.memory_space<vmem>>, vector<1x1x1024xbf16>
    tpu.vector_store %arg5[%c0_11, %c3, %c0_12], %12 {strides = array<i32>} : memref<1x4x1024xbf16, #tpu.memory_space<vmem>>, vector<1x1x1024xbf16>,
    return
  }
  func.func @transform_0(%arg0: i32, %arg1: i32) -> (i32, i32, i32) {
    %c0_i32 = arith.constant 0 : i32
    %c0_i32_0 = arith.constant 0 : i32
    return %arg0, %c0_i32, %arg1 : i32, i32, i32
  }
  func.func @transform_1(%arg0: i32, %arg1: i32) -> (i32, i32, i32) {
    %c0_i32 = arith.constant 0 : i32
    %c0_i32_0 = arith.constant 0 : i32
    return %arg0, %c0_i32, %arg1 : i32, i32, i32
  }
  func.func @transform_2(%arg0: i32, %arg1: i32) -> (i32, i32, i32) {
    %c0_i32 = arith.constant 0 : i32
    %c0_i32_0 = arith.constant 0 : i32
    %c0_i32_1 = arith.constant 0 : i32
    return %arg0, %c0_i32, %c0_i32_0 : i32, i32, i32
  }
  func.func @transform_3(%arg0: i32, %arg1: i32) -> (i32, i32, i32) {
    %c0_i32 = arith.constant 0 : i32
    %c0_i32_0 = arith.constant 0 : i32
    return %arg0, %c0_i32, %arg1 : i32, i32, i32
  }
}

</mosaic_0001>

<bundles_post_ra>
// kernel: tpu_custom_call.1
= control target key start
LH: loop header
LB: loop body
LE: loop exit
PB: predicated region body
PF: predicated region fallthrough
CT: control target
= control target key end

     0   :  { %8 = vsyncpa [#allocation3], 0  ;;  %s1088_s0 = inlined_call_operand.vmem [shape: f32[2,3,1024], index: 0, kind: input, shape index: {}]   ;;  %s1089_s1 = inlined_call_operand.vmem [shape: u8[2,1,1024], index: 1, kind: input, shape index: {}]   ;;  %s1090_s2 = inlined_call_operand.vmem [shape: f32[2,1,1024], index: 2, kind: input, shape index: {}]   ;;  %s1091_s3 = inlined_call_operand.hbm [shape: bf16[2,4,1024], index: 3, kind: output, shape index: {}]  }
   0x1   :  { %10 = vsyncpa [#allocation3 + $0x1], 0  ;;  %s825_s12 = smov 0   ;;  %s827_s13 = smov 0  }
   0x2   :  { %s829_s14 = smov 0   ;;  %s831_s15 = smov 0  }
   0x3   :  { %s833_s16 = smov 0   ;;  %s835_s17 = smov 0  }
   0x4 LB: > { %s653_s18 = sadd.s32 4294967295, %s803_s17   ;;  %s654_s19 = sadd.s32 4294967294, %s803_s17   ;;  %s803_s17 = sphi %s835_s17, %s16_s17   ;;  %s799_s16 = sphi %s833_s16, %s1116_s16   ;;  %s795_s15 = sphi %s831_s15, %s1115_s15   ;;  %s791_s14 = sphi %s829_s14, %s1114_s14   ;;  %s787_s13 = sphi %s827_s13, %s1113_s13   ;;  %s783_s12 = sphi %s825_s12, %s1112_s12  }
   0x5   : > { %s28_s20 = sadd.s32 1, %s799_s16  ;;  %s119_s21 = sadd.s32 1, %s791_s14 }
   0x6   : > { %p30_p0 = scmp.ge.s32.totalorder %s28_s20, 2  ;;  %p129_p1 = scmp.ne.s32.totalorder %s791_s14, %s787_s13 }
   0x7   : > { %p130_p2 = scmp.eq.s32.totalorder %s653_s18, 1  ;;  %p135_p3 = scmp.ne.s32.totalorder %s787_s13, %s783_s12 }
   0x8   : > { %s1118_s20 = smov (%p30_p0, %s28_s20), 0  ;;  %p136_p5 = scmp.eq.s32.totalorder %s654_s19, 1 }
   0x9   : > { %p865_p4 = por %p130_p2, %p129_p1  ;;  %s114_s23 = ssub.s32 %s799_s16, %s1118_s20 }
   0xa   : > { %p657_p6 = scmp.ge.s32.totalorder %s803_s17, 1  ;;  %p117_p7 = scmp.eq.s32.totalorder %s114_s23, 0 }
   0xb   : > { %p872_p8 = por %p136_p5, %p135_p3  ;;  %p186_p9 = scmp.lt.s32.totalorder %s803_s17, 3 }
   0xc   : > { %s878_s25 = scalar_select %p117_p7, %s791_s14, %s119_s21  }
   0xd   : > { %p187_p10 = pnand %p657_p6, %p186_p9 }
   0xe   : > { %p227_p11 = scmp.lt.s32.totalorder (!%p187_p10), %s795_s15, 1  ;;  %s223_s11 = sand.u32 (!%p187_p10), 1, %s787_s13  }
   0xf   : > { %190 = sbr.rel (%p187_p10) target bundleno = 80 (0x50), region = 32  ;;  %s944_s18 = sshll.u32 (!%p187_p10), %s223_s11, 4 }
  0x10   : > { %s987_s19 = scalar_lea.vmem (!%p187_p10), [#allocation2], %s944_s18  ;;  %s669_s21 = sshll.u32 (!%p187_p10), %s795_s15, 4 }
  0x11   : > { %s532_s29 = scalar_lea.sflag (!%p187_p10), [#allocation3], %s223_s11 }
  0x14   : > { %s882_s26 = scalar_select %p227_p11, %s795_s15, 1  ;;  %vm311_vm0 = vcmask 1043456   ;;  %vm417_vm1 = vcmask 1041408   ;;  %vm436_vm2 = vsmask.f32 1280  ;;  %vm438_vm3 = vcmask 1043458  }
  0x15   : > { %vm439_vm4 = vsmask.f32 3328  ;;  %vm421_vm5 = vcmask 1045508   ;;  %vm914_vm6 = vmand %vm417_vm1, %vm436_vm2  ;;  %vm443_vm8 = vsmask.f32 5376  ;;  %vm446_vm10 = vcmask 1047558  }
  0x16   : > { %s661_s27 = sshll.u32 %s882_s26, 3  ;;  %s668_s4 = sshll.u32 %s882_s26, 5  ;;  %vm920_vm7 = vmand %vm438_vm3, %vm439_vm4  ;;  %vm447_vm11 = vsmask.f32 7424  ;;  %vm510_vm12 = vcmask 1041409   ;;  %vm513_vm15 = vcmask 1043459  }
  0x17   : > { %s243_s30 = scalar_lea.vmem %s1089_s1, %s661_s27  ;;  %s894_s7 = scalar_lea.vmem %s1088_s0, %s668_s4  ;;  %vm441_vm9 = vmor %vm920_vm7, %vm914_vm6  ;;  %vm511_vm14 = vsmask.f32 7942  ;;  %vm514_vm2 = vsmask.f32 7950 }
  0x18   : > { %v250_v0 = vld [vmem:[%s243_s30] sm:$0xff]  ;;  %s248_s10 = scalar_lea.vmem %s1090_s2, %s661_s27  ;;  %v264_v42 = vld [vmem:[%s894_s7 + $0x8] sm:$0x77]  ;;  %v265_v53 = vld [vmem:[%s894_s7 + $0x10] sm:$0x77]  ;;  %s545_s26 = scalar_lea.hbm %s1091_s3, %s669_s21 }
  0x19   : > { %v251_v1 = vunpack.c.0.s8 %v250_v0  ;;  %v252_v2 = vunpack.c.1.s8 %v250_v0  ;;  %v253_v3 = vunpack.c.2.s8 %v250_v0  ;;  %v254_v4 = vunpack.c.3.s8 %v250_v0  ;;  %v263_v37 = vld [vmem:[%s894_s7] sm:$0x77]  ;;  %vm938_vm13 = vmand %vm421_vm5, %vm443_vm8  ;;  %s547_s27 = sshll.u32 %s987_s19, 4  ;;  %s549_s28 = sshll.u32 %s545_s26, 4  ;;  %s548_s27 = int_to_ptr.vmem [resolvable:$true] %s547_s27  ;;  %s550_s28 = int_to_ptr.hbm [resolvable:$true] %s549_s28 }
  0x1a   : > { %v908_v56 = vld [vmem:[%s248_s10] sm:$0xff]  ;;  %vm956_vm3 = vmor %vm938_vm13, %vm441_vm9  ;;  %vm518_vm8 = vsmask.f32 7958  ;;  %vm517_vm9 = vcmask 1045509   ;;  %s739_s30 = sshra.s32 %s550_s28, 4  ;;  %s740_s30 = int_to_ptr.hbm [resolvable:$true] %s739_s30 }
  0x1b   : > { %v255_v5 = vand.u32 255, %v251_v1  ;;  %v256_v6 = vand.u32 255, %v252_v2  ;;  %v257_v7 = vand.u32 255, %v253_v3  ;;  %v258_v8 = vand.u32 255, %v254_v4  ;;  %vm962_vm4 = vmand %vm446_vm10, %vm447_vm11  ;;  %s741_s4 = scalar_lea.hbm %s740_s30, 16  ;;  %p746_p1 = scmp.lt.s32.totalorder %s740_s30, %s1091_s3 }
  0x1c   : > { %vm970_vm6 = vmand %vm510_vm12, %vm511_vm14  ;;  %vm521_vm12 = vcmask 1047559   ;;  %vm522_vm14 = vsmask.f32 7966  ;;  %p742_p12 = scmp.ne.s32.totalorder %s740_s30, %s741_s4 }
  0x1d   : > { %v259_v9 = vcvt.s32.f32 %v255_v5  ;;  %v260_v10 = vcvt.s32.f32 %v256_v6  ;;  %v261_v11 = vcvt.s32.f32 %v257_v7  ;;  %v262_v12 = vcvt.s32.f32 %v258_v8  ;;  %vm977_vm7 = vmand %vm513_vm15, %vm514_vm2 }
  0x1e   : > { %vm449_vm10 = vmor %vm962_vm4, %vm956_vm3  ;;  %p743_p13 = pnand %p742_p12, %p865_p4 }
  0x1f   : > { %v267_v13 = vsub.f32 1.0, %v259_v9  ;;  %v328_v14 = vperm.slane %v259_v9, 0  ;;  %v329_v15 = vperm.slane %v259_v9, 4  ;;  %v268_v16 = vsub.f32 1.0, %v260_v10  ;;  %vm516_vm11 = vmor %vm977_vm7, %vm970_vm6 }
  0x20   : > { %v330_v17 = vperm.slane %v260_v10, 0  ;;  %v331_v18 = vperm.slane %v260_v10, 4  ;;  %v269_v19 = vsub.f32 1.0, %v261_v11  ;;  %v332_v20 = vperm.slane %v261_v11, 0  ;;  %vm519_vm13 = vmand %vm517_vm9, %vm518_vm8  ;;  %p744_p0 = pneg %p743_p13 }
  0x21   : > { %v275_v21 = vperm.slane %v267_v13, 0  ;;  %v276_v22 = vperm.slane %v267_v13, 4  ;;  %v344_v23 = vperm.slane %v328_v14, 0  ;;  %v345_v24 = vperm.slane %v329_v15, 0  ;;  %v266_v14 = vld [vmem:[%s894_s7 + $0x18] sm:$0x77]  ;;  %vm1009_vm15 = vmor %vm519_vm13, %vm516_vm11 }
  0x22   : > { %v277_v25 = vperm.slane %v268_v16, 0  ;;  %v278_v26 = vperm.slane %v268_v16, 4  ;;  %v346_v27 = vperm.slane %v330_v17, 0  ;;  %v347_v28 = vperm.slane %v331_v18, 0  ;;  %vm1014_vm2 = vmand %vm521_vm12, %vm522_vm14  ;;  %s745_s7 = scalar_lea.hbm %s1091_s3, 32 }
  0x23   : > { %v291_v29 = vperm.slane %v275_v21, 0  ;;  %v292_v30 = vperm.slane %v276_v22, 0  ;;  %v360_v31 = vrot.slane %v345_v24, 4  ;;  %v279_v32 = vperm.slane %v269_v19, 0  ;;  %vm524_vm6 = vmor %vm1014_vm2, %vm1009_vm15  ;;  %p747_p2 = scmp.lt.s32.totalorder %s745_s7, %s741_s4 }
  0x24   : > { %v293_v33 = vperm.slane %v277_v25, 0  ;;  %v294_v34 = vperm.slane %v278_v26, 0  ;;  %v361_v35 = vrot.slane %v347_v28, 4  ;;  %v280_v36 = vperm.slane %v269_v19, 4 }
  0x25   : > { %v307_v38 = vrot.slane %v292_v30, 4  ;;  %v364_v39 = vsel %vm311_vm0, %v344_v23, %v360_v31  ;;  %v295_v40 = vperm.slane %v279_v32, 0  ;;  %v333_v41 = vperm.slane %v261_v11, 4  ;;  %p748_p3 = por %p747_p2, %p746_p1 }
  0x26   : > { %v308_v43 = vrot.slane %v294_v34, 4  ;;  %v365_v44 = vsel %vm311_vm0, %v346_v27, %v361_v35  ;;  %v296_v45 = vperm.slane %v280_v36, 0  ;;  %v348_v46 = vperm.slane %v332_v20, 0 }
  0x27   : > { %v312_v47 = vsel %vm311_vm0, %v291_v29, %v307_v38  ;;  %v349_v48 = vperm.slane %v333_v41, 0  ;;  %v270_v49 = vsub.f32 1.0, %v262_v12  ;;  %v334_v50 = vperm.slane %v262_v12, 0  ;;  %p749_p5 = pnand %p748_p3, %p744_p0 }
  0x28   : > { %v320_v51 = vmul.f32 %v312_v47, %v263_v37  ;;  %v313_v52 = vsel %vm311_vm0, %v293_v33, %v308_v43  ;;  %v309_v54 = vrot.slane %v296_v45, 4  ;;  %v335_v55 = vperm.slane %v262_v12, 4 }
  0x29   : > { %v321_v57 = vmul.f32 %v313_v52, %v264_v42  ;;  %v362_v58 = vrot.slane %v349_v48, 4  ;;  %v281_v59 = vperm.slane %v270_v49, 0  ;;  %v282_v60 = vperm.slane %v270_v49, 4 }
  0x2a   : > { %v372_v61 = vadd.f32 %v364_v39, %v320_v51  ;;  %v314_v62 = vsel %vm311_vm0, %v295_v40, %v309_v54  ;;  %v350_v63 = vperm.slane %v334_v50, 0  ;;  %v351_v0 = vperm.slane %v335_v55, 0  ;;  %v450_v50 = vld [vmem:[%s987_s19] sm:$0xff] }
  0x2b   : > { %v373_v1 = vadd.f32 %v365_v44, %v321_v57  ;;  %v322_v2 = vmul.f32 %v314_v62, %v265_v53  ;;  %v366_v3 = vsel %vm311_vm0, %v348_v46, %v362_v58  ;;  %v297_v4 = vperm.slane %v281_v59, 0 }
  0x2c   : > { %380 = vst [vmem:[#allocation1] ss:$2 sm:$0xff] %v372_v61  ;;  %v298_v6 = vperm.slane %v282_v60, 0  ;;  %v363_v7 = vrot.slane %v351_v0, 4  ;;  %v458_v9 = vperm.slane %v908_v56, 0  ;;  %v459_v10 = vperm.slane %v908_v56, 1 }
  0x2d   : > { %382 = vst [vmem:[#allocation1 + $0x10] ss:$2 sm:$0xff] %v373_v1  ;;  %v374_v11 = vadd.f32 %v366_v3, %v322_v2  ;;  %v460_v12 = vperm.slane %v908_v56, 2  ;;  %v461_v13 = vperm.slane %v908_v56, 3  ;;  %v462_v25 = vperm.slane %v908_v56, 4 }
  0x2e   : > { %v310_v15 = vrot.slane %v298_v6, 4  ;;  %v474_v16 = vpack.c.bf16 %v459_v10, %v458_v9  ;;  %v367_v19 = vsel %vm311_vm0, %v350_v63, %v363_v7  ;;  %v463_v26 = vperm.slane %v908_v56, 5  ;;  %v453_v7 = vld [vmem:[%s987_s19 + $0x8] sm:$0xff] }
  0x2f   : > { %384 = vst [vmem:[#allocation1 + $0x20] ss:$2 sm:$0xff] %v374_v11  ;;  %v475_v17 = vpack.c.bf16 %v461_v13, %v460_v12  ;;  %v464_v27 = vperm.slane %v908_v56, 6  ;;  %v465_v40 = vperm.slane %v908_v56, 7 }
  0x30   : > { %v315_v18 = vsel %vm311_vm0, %v297_v4, %v310_v15  ;;  %v482_v22 = vrot.slane %v474_v16, 2  ;;  %v476_v44 = vpack.c.bf16 %v463_v26, %v462_v25 }
  0x31   : > { %v323_v21 = vmul.f32 %v315_v18, %v266_v14  ;;  %v483_v23 = vrot.slane %v475_v17, 4  ;;  %v484_v24 = vrot.slane %v475_v17, 6  ;;  %v477_v48 = vpack.c.bf16 %v465_v40, %v464_v27 }
  0x32   : > { %v490_v37 = vsel %vm417_vm1, %v474_v16, %v482_v22  ;;  %v485_v55 = vrot.slane %v476_v44, 2 }
  0x33   : > { %v375_v28 = vadd.f32 %v367_v19, %v323_v21  ;;  %v387_v29 = vld.sshfl [vmem:[#allocation1] sm:$0xff pattern:$0x75316420]  ;;  %v388_v30 = vld.sshfl [vmem:[#allocation1 + $0x8] sm:$0xff pattern:$0x75316420]  ;;  %v493_v38 = vsel %vm421_vm5, %v483_v23, %v484_v24 }
  0x34   : > { %v389_v32 = vld.sshfl [vmem:[#allocation1 + $0x10] sm:$0xff pattern:$0x75316420]  ;;  %v390_v33 = vld.sshfl [vmem:[#allocation1 + $0x18] sm:$0xff pattern:$0x75316420]  ;;  %v403_v34 = vpack.c.bf16 %v388_v30, %v387_v29  ;;  %v494_v52 = vsel %vm311_vm0, %v490_v37, %v493_v38  ;;  %v497_v2 = vsel %vm417_vm1, %v476_v44, %v485_v55 }
  0x35   : > { %386 = vst [vmem:[#allocation1 + $0x30] ss:$2 sm:$0xff] %v375_v28  ;;  %v404_v36 = vpack.c.bf16 %v390_v33, %v389_v32  ;;  %v486_v56 = vrot.slane %v477_v48, 4  ;;  %v487_v57 = vrot.slane %v477_v48, 6  ;;  %v502_v60 = vshll.u32 %v494_v52, 16 }
  0x36   : > { %v411_v41 = vrot.slane %v403_v34, 2  ;;  %v391_v42 = vld.sshfl [vmem:[#allocation1 + $0x20] sm:$0xff pattern:$0x75316420] }
  0x37   : > { %v412_v45 = vrot.slane %v404_v36, 4  ;;  %v413_v46 = vrot.slane %v404_v36, 6  ;;  %v392_v47 = vld.sshfl [vmem:[#allocation1 + $0x28] sm:$0xff pattern:$0x75316420]  ;;  %v500_v3 = vsel %vm421_vm5, %v486_v56, %v487_v57  ;;  %v504_v8 = vrot.slane %v502_v60, 7 }
  0x38   : > { %v420_v49 = vsel %vm417_vm1, %v403_v34, %v411_v41  ;;  %v405_v51 = vpack.c.bf16 %v392_v47, %v391_v42  ;;  %v501_v10 = vsel %vm311_vm0, %v497_v2, %v500_v3 }
  0x39   : > { %v424_v53 = vsel %vm421_vm5, %v412_v45, %v413_v46  ;;  %v505_v15 = vshll.u32 %v501_v10, 16 }
  0x3a   : > { %v425_v54 = vsel %vm311_vm0, %v420_v49, %v424_v53  ;;  %v414_v59 = vrot.slane %v405_v51, 2 }
  0x3b   : > { %v451_v58 = vsel %vm449_vm10, %v425_v54, %v450_v50  ;;  %v507_v16 = vrot.slane %v505_v15, 7 }
  0x3c   : > { %452 = vst [vmem:[%s987_s19] sm:$0xff] %v451_v58  ;;  %v393_v61 = vld.sshfl [vmem:[#allocation1 + $0x30] sm:$0xff pattern:$0x75316420]  ;;  %v394_v62 = vld.sshfl [vmem:[#allocation1 + $0x38] sm:$0xff pattern:$0x75316420]  ;;  %v428_v6 = vsel %vm417_vm1, %v405_v51, %v414_v59 }
  0x3d   : > { %v406_v63 = vpack.c.bf16 %v394_v62, %v393_v61 }
  0x3f   : > { %v415_v4 = vrot.slane %v406_v63, 4  ;;  %v416_v5 = vrot.slane %v406_v63, 6 }
  0x41   : > { %v431_v9 = vsel %vm421_vm5, %v415_v4, %v416_v5 }
  0x42   : > { %v432_v11 = vsel %vm311_vm0, %v428_v6, %v431_v9 }
  0x43   : > { %v454_v12 = vsel %vm449_vm10, %v432_v11, %v453_v7  ;;  %v525_v13 = vld [vmem:[%s987_s19] sm:$0xaa] }
  0x44   : > { %455 = vst [vmem:[%s987_s19 + $0x8] sm:$0xff] %v454_v12  ;;  %v526_v14 = vsel %vm524_vm6, %v504_v8, %v525_v13 }
  0x45   : > { %527 = vst [vmem:[%s987_s19] sm:$0xaa] %v526_v14 }
  0x4b   : > { %v528_v17 = vld [vmem:[%s987_s19 + $0x8] sm:$0xaa] }
  0x4c   : > { %v529_v18 = vsel %vm524_vm6, %v507_v16, %v528_v17 }
  0x4d   : > { %530 = vst [vmem:[%s987_s19 + $0x8] sm:$0xaa] %v529_v18 }
  0x4e   : > { %752 = shalt.err (!%p749_p5)
}
  0x4f   : > { %670 = dma.vmem_to_hbm [thread:$0]  (%p865_p4), %s548_s27, 256, %s550_s28, %s532_s29  }
  0x50 PF: > { %p676_p6 = scmp.ge.s32.totalorder %s803_s17, 2  ;;  %s561_s10 = sand.u32 1, %s783_s12  }
  0x51   : > { %s562_s11 = scalar_lea.sflag [#allocation3], %s561_s10 }
  0x52   : > { %p673_p7 = pnand %p676_p6, %p872_p8 }
  0x54   : > { %p674_p9 = pneg %p673_p7 }
  0x56   : > { %778 = dma.done.wait (%p674_p9), %s562_s11, 256  }
  0x57   : > { %780 = vsyncadd (%p674_p9), %s562_s11, 4294967040  ;;  %s16_s17 = sadd.s32 1, %s803_s17   ;;  %s1112_s12 = smov %s787_s13 }
  0x58   : > { %p13_p10 = scmp.ge.s32.totalorder %s16_s17, 4   ;;  %s1113_s13 = smov %s791_s14 }
  0x59   : > { %s1114_s14 = smov %s878_s25  ;;  %s1115_s15 = smov %s799_s16 }
  0x5a   : > { %s1116_s16 = smov %s1118_s20  ;;  %15 = sbr.rel (!%p13_p10) target bundleno = 4 (0x4), region = 76 }
  0x5f   :  { %568 = vsyncpa [#allocation3], 1 }
  0x60   :  { %570 = vsyncpa [#allocation3 + $0x1], 1 }

</bundles_post_ra>
